<compile_context>
chip_gen: v6e
topology: v6e:2x2x1
jax: 0.10.0
libtpu: 0.0.40
codegen_flags: <defaults>
</compile_context>

<pallas_src>
import functools

import jax
import jax.numpy as jnp
from jax import lax
from jax.experimental import pallas as pl
from jax.experimental.pallas import tpu as pltpu

_LANE = 128
_NEG_INF = -1e30     # finite "minus infinity": exp() underflows to 0, no inf-inf NaNs
_BN_EPS = 1e-5


def _round_up(v, m):
    return (v + m - 1) // m * m


# ---------------------------------------------------------------------------
# Kernel 1: fused [BatchNorm -> Linear -> tanh] x L on the concatenated [x; x_n]
# ---------------------------------------------------------------------------

def _featurize_kernel(*refs, n_layers, n_x, eps):
    # refs = (x_cat, selector, [w_t, b, gamma, beta] * n_layers, out)
    xcat_ref, sel_ref = refs[0], refs[1]
    layer_refs = refs[2:2 + 4 * n_layers]
    out_ref = refs[2 + 4 * n_layers]

    h = xcat_ref[...]                                  # (R, D) f32, R = B + N
    sel = sel_ref[...]                                 # (2, R): [1/B on x rows | 1/N on x_n rows]
    row = lax.broadcasted_iota(jnp.int32, (h.shape[0], 1), 0)
    is_x = row < n_x                                   # (R, 1) block selector

    for i in range(n_layers):
        w = layer_refs[4 * i][...]                     # (Din_p, Dout_p) bf16, pre-transposed
        b = layer_refs[4 * i + 1][...]                 # (1, Dout_p) f32
        g = layer_refs[4 * i + 2][...]                 # (1, Din_p)  f32
        bt = layer_refs[4 * i + 3][...]                # (1, Din_p)  f32

        # Per-block BN stats on the MXU, lane-dense (2, Din): row 0 = x stats, row 1 = x_n stats.
        mean2 = lax.dot_general(sel, h, (((1,), (0,)), ((), ())),
                                preferred_element_type=jnp.float32)
        msq2 = lax.dot_general(sel, h * h, (((1,), (0,)), ((), ())),
                               preferred_element_type=jnp.float32)
        mean = jnp.where(is_x, mean2[0:1, :], mean2[1:2, :])     # (R, Din) per-block apply
        msq = jnp.where(is_x, msq2[0:1, :], msq2[1:2, :])
        var = jnp.maximum(msq - mean * mean, 0.0)                # biased var (training-mode BN)
        hn = (h - mean) * lax.rsqrt(var + eps) * g + bt

        # Linear (bf16 operands on the MXU, f32 accumulate) + tanh in f32.
        y = lax.dot_general(hn.astype(jnp.bfloat16), w, (((1,), (0,)), ((), ())),
                            preferred_element_type=jnp.float32) + b
        h = jnp.tanh(y)

    out_ref[...] = h


# ---------------------------------------------------------------------------
# Kernel 2: gridded flash-style NONA head (online softmax over neighbor tiles)
# ---------------------------------------------------------------------------

def _nona_head_kernel(fx_ref, fn_ref, yn2_ref, o_ref, m_ref, nd_ref,
                      *, n_real, tile_b, tile_n, train):
    j = pl.program_id(1)

    @pl.when(j == 0)
    def _():
        m_ref[...] = jnp.full_like(m_ref, _NEG_INF)
        nd_ref[...] = jnp.zeros_like(nd_ref)

    fx = fx_ref[...]                                   # (tB, D) query features (f32)
    fn = fn_ref[...]                                   # (tN, D) neighbor features (f32)
    d = fx.shape[-1]
    ones_d = jnp.ones((1, d), jnp.float32)

    # Squared norms via MXU (lane-dense / column), cross term in bf16.
    x_sq = lax.dot_general(ones_d, fx * fx, (((1,), (1,)), ((), ())),
                           preferred_element_type=jnp.float32)             # (1, tB)
    n_sq = lax.dot_general(fn * fn, ones_d, (((1,), (1,)), ((), ())),
                           preferred_element_type=jnp.float32)             # (tN, 1)
    cross = lax.dot_general(fn.astype(jnp.bfloat16), fx.astype(jnp.bfloat16),
                            (((1,), (1,)), ((), ())),
                            preferred_element_type=jnp.float32)            # (tN, tB)

    d2 = jnp.maximum(n_sq + x_sq - 2.0 * cross, 0.0)
    sim = -jnp.sqrt(d2)                                # (tN, tB): queries on the lane axis

    # Mask padded neighbors; in train mode also mask the self-similarity diagonal.
    g_n = lax.broadcasted_iota(jnp.int32, sim.shape, 0) + j * tile_n
    mask = g_n >= n_real
    if train:
        # TODO(synk): degenerate B == N == 1 train case gives NaN in PyTorch; here the
        # finite _NEG_INF mask yields y_n[0] instead.
        g_b = lax.broadcasted_iota(jnp.int32, sim.shape, 1) + pl.program_id(0) * tile_b
        mask = jnp.logical_or(mask, g_n == g_b)
    sim = jnp.where(mask, _NEG_INF, sim)

    # Online softmax update, everything lane-dense over queries.
    tile_max = jnp.max(sim, axis=0, keepdims=True)                          # (1, tB)
    m_new = jnp.maximum(m_ref[...], tile_max)
    alpha = jnp.exp(m_ref[...] - m_new)                                     # (1, tB)
    p = jnp.exp(sim - m_new)                                                # (tN, tB)
    # yn2 = [y_n; ones] (2, tN): row 0 -> numerator, row 1 -> denominator, in one matmul.
    nd_tile = lax.dot_general(yn2_ref[...].astype(jnp.bfloat16), p.astype(jnp.bfloat16),
                              (((1,), (0,)), ((), ())),
                              preferred_element_type=jnp.float32)           # (2, tB)
    nd_ref[...] = alpha * nd_ref[...] + nd_tile
    m_ref[...] = m_new

    @pl.when(j == pl.num_programs(1) - 1)
    def _():
        out = nd_ref[0:1, :] * pl.reciprocal(nd_ref[1:2, :], approx=True)   # (1, tB)
        o_ref[0] = jnp.clip(out, 0.0, 1.0)


# ---------------------------------------------------------------------------
# Parameters (padded / pre-transposed / pre-cast once at init) + forward wrapper
# ---------------------------------------------------------------------------

def init_params(key, input_size, hl_sizes):
    dims = [input_size] + list(hl_sizes)
    flat = []          # kernel-side packed params (padded, w in bf16)
    ref_layers = []    # unpadded f32 params for the pure-JAX reference
    for i in range(len(dims) - 1):
        din, dout = dims[i], dims[i + 1]
        din_p, dout_p = _round_up(din, _LANE), _round_up(dout, _LANE)
        key, kw, kb = jax.random.split(key, 3)
        bound = float(1.0 / (din ** 0.5))
        w = jax.random.uniform(kw, (dout, din), jnp.float32, -bound, bound)
        b = jax.random.uniform(kb, (dout,), jnp.float32, -bound, bound)
        gamma = jnp.ones((din,), jnp.float32)
        beta = jnp.zeros((din,), jnp.float32)
        ref_layers.append(dict(w_t=w.T, b=b[None, :], gamma=gamma[None, :], beta=beta[None, :]))
        # 128-lane padded, pre-transposed / pre-reshaped; padded rows & cols are zero so
        # padded feature lanes remain exactly 0 through BN -> Linear -> tanh.
        w_t_p = jnp.zeros((din_p, dout_p), jnp.float32).at[:din, :dout].set(w.T)
        flat += [w_t_p.astype(jnp.bfloat16),
                 jnp.zeros((1, dout_p), jnp.float32).at[:, :dout].set(b),
                 jnp.zeros((1, din_p), jnp.float32).at[:, :din].set(gamma),
                 jnp.zeros((1, din_p), jnp.float32).at[:, :din].set(beta)]
    return dict(flat=tuple(flat), ref_layers=ref_layers,
                input_size=input_size, hl_sizes=tuple(hl_sizes))


@functools.partial(jax.jit, static_argnames=("train",))
def _forward_impl(flat, x, x_n, y_n, *, train):
    x = x.astype(jnp.float32)
    x_n = x_n.astype(jnp.float32)
    y_n = y_n.astype(jnp.float32)

    B, d_in = x.shape
    N = x_n.shape[0]
    R = B + N
    n_layers = len(flat) // 4
    d_in_pad = flat[0].shape[0] if n_layers else _round_up(d_in, _LANE)
    d_out_pad = flat[4 * (n_layers - 1)].shape[1] if n_layers else d_in_pad

    # ---- featurize: one call for x and x_n together -------------------------
    xcat = jnp.pad(jnp.concatenate([x, x_n], axis=0), ((0, 0), (0, d_in_pad - d_in)))
    r = jnp.arange(R)
    sel = jnp.stack([jnp.where(r < B, 1.0 / B, 0.0),
                     jnp.where(r >= B, 1.0 / N, 0.0)]).astype(jnp.float32)   # (2, R)

    feats = pl.pallas_call(
        functools.partial(_featurize_kernel, n_layers=n_layers, n_x=B, eps=_BN_EPS),
        out_shape=jax.ShapeDtypeStruct((R, d_out_pad), jnp.float32),
        in_specs=[pl.BlockSpec(memory_space=pltpu.MemorySpace.VMEM)] * (2 + 4 * n_layers),
        out_specs=pl.BlockSpec(memory_space=pltpu.MemorySpace.VMEM),
    )(xcat, sel, *flat)

    # ---- gridded NONA head ---------------------------------------------------
    tile_b = _LANE
    tile_n = _LANE
    b_pad = _round_up(B, tile_b)
    n_pad = _round_up(N, tile_n)
    nb, nn = b_pad // tile_b, n_pad // tile_n

    fx = jnp.pad(feats[:B], ((0, b_pad - B), (0, 0)))      # padded query rows are sliced off
    fn = jnp.pad(feats[B:], ((0, n_pad - N), (0, 0)))      # padded neighbors masked in-kernel
    yn2 = jnp.stack([jnp.pad(y_n, (0, n_pad - N)), jnp.ones((n_pad,), jnp.float32)])  # (2, N_p)

    out = pl.pallas_call(
        functools.partial(_nona_head_kernel, n_real=N, tile_b=tile_b, tile_n=tile_n,
                          train=train),
        out_shape=jax.ShapeDtypeStruct((nb, 1, tile_b), jnp.float32),   # lane-dense rows
        grid_spec=pltpu.PrefetchScalarGridSpec(
            num_scalar_prefetch=0,
            grid=(nb, nn),                                   # neighbor (reduction) axis last
            in_specs=[
                pl.BlockSpec((tile_b, d_out_pad), lambda i, j: (i, 0)),
                pl.BlockSpec((tile_n, d_out_pad), lambda i, j: (j, 0)),
                pl.BlockSpec((2, tile_n), lambda i, j: (0, j)),
            ],
            out_specs=pl.BlockSpec((1, 1, tile_b), lambda i, j: (i, 0, 0)),
            scratch_shapes=[pltpu.VMEM((1, tile_b), jnp.float32),    # running max m
                            pltpu.VMEM((2, tile_b), jnp.float32)],   # [numerator; denominator]
        ),
        compiler_params=pltpu.CompilerParams(
            dimension_semantics=("parallel", "arbitrary")),
    )(fx, fn, yn2)

    return out.reshape(nb * tile_b)[:B]                     # .squeeze()


def nn_forward(params, x, x_n, y_n, train=None):
    """Full NN forward. `train` is a static flag (no device sync is ever performed)."""
    if train is None:
        # TODO(synk): PyTorch decides train via torch.equal on the *transformed* features;
        # we only use object identity (sync-free) — pass train= explicitly for value-equal
        # but distinct arrays.
        train = x is x_n
    return _forward_impl(params["flat"], x, x_n, y_n, train=bool(train))


# ---------------------------------------------------------------------------
# Pure-JAX reference (f32, unpadded) for correctness check only
# ---------------------------------------------------------------------------

def reference_forward(params, x, x_n, y_n, train):
    x = x.astype(jnp.float32)
    x_n = x_n.astype(jnp.float32)
    y_n = y_n.astype(jnp.float32)

    def bn_lin_tanh(h, p):
        mean = jnp.mean(h, axis=0, keepdims=True)
        var = jnp.mean((h - mean) ** 2, axis=0, keepdims=True)
        hn = (h - mean) / jnp.sqrt(var + _BN_EPS) * p["gamma"] + p["beta"]
        return jnp.tanh(hn @ p["w_t"] + p["b"])

    for p in params["ref_layers"]:
        x = bn_lin_tanh(x, p)
        x_n = bn_lin_tanh(x_n, p)

    d2 = jnp.maximum(
        jnp.sum(x * x, -1, keepdims=True)
        + jnp.sum(x_n * x_n, -1)[None, :]
        - 2.0 * (x @ x_n.T), 0.0)
    sim = -jnp.sqrt(d2)
    if train:
        sim = sim - jnp.diag(jnp.full((x.shape[0],), jnp.inf))
    return jnp.clip(jax.nn.softmax(sim, axis=1) @ y_n, 0.0, 1.0)


# ---------------------------------------------------------------------------
if __name__ == "__main__":
    key = jax.random.PRNGKey(0)

    input_size = 16
    hl_sizes = [32, 32]
    B, N = 8, 8

    kx, kxn, ky, kp = jax.random.split(key, 4)
    x = jax.random.normal(kx, (B, input_size), jnp.float32)
    x_n = jax.random.normal(kxn, (N, input_size), jnp.float32)
    y_n = jax.random.uniform(ky, (N,), jnp.float32)   # labels in [0, 1]

    params = init_params(kp, input_size, hl_sizes)

    # eval-style path (x != x_n, no diagonal mask)
    out_eval = nn_forward(params, x, x_n, y_n, train=False)
    jax.block_until_ready(out_eval)

    # training path (x_n is x => diagonal self-similarity mask), detected without host sync
    out_train = nn_forward(params, x, x, y_n[:B])
    jax.block_until_ready(out_train)

    ref_eval = reference_forward(params, x, x_n, y_n, train=False)
    ref_train = reference_forward(params, x, x, y_n[:B], train=True)

    assert out_eval.shape == (B,) and out_train.shape == (B,)
    assert bool(jnp.all(jnp.isfinite(out_eval))) and bool(jnp.all(jnp.isfinite(out_train)))
    assert bool(jnp.all((out_eval >= 0.0) & (out_eval <= 1.0)))
    assert bool(jnp.all((out_train >= 0.0) & (out_train <= 1.0)))
    # 5e-2 tolerance accounts for bf16 MXU operands + approx reciprocal vs. f32 reference.
    assert bool(jnp.allclose(out_eval, ref_eval, atol=5e-2))
    assert bool(jnp.allclose(out_train, ref_train, atol=5e-2))

    print("KERNEL_OK")
</pallas_src>

<mosaic_0001>
module attributes {stable_mosaic.version = 11 : i64} {
  func.func @_featurize_kernel(%arg0: memref<16x128xf32, #tpu.memory_space<vmem>>, %arg1: memref<2x16xf32, #tpu.memory_space<vmem>>, %arg2: memref<128x128xbf16, #tpu.memory_space<vmem>>, %arg3: memref<1x128xf32, #tpu.memory_space<vmem>>, %arg4: memref<1x128xf32, #tpu.memory_space<vmem>>, %arg5: memref<1x128xf32, #tpu.memory_space<vmem>>, %arg6: memref<128x128xbf16, #tpu.memory_space<vmem>>, %arg7: memref<1x128xf32, #tpu.memory_space<vmem>>, %arg8: memref<1x128xf32, #tpu.memory_space<vmem>>, %arg9: memref<1x128xf32, #tpu.memory_space<vmem>>, %arg10: memref<16x128xf32, #tpu.memory_space<vmem>>) attributes {dimension_semantics = [], scalar_prefetch = 0 : i64, scratch_operands = 0 : i64, tpu.core_type = #tpu.core_type<tc>} {
    %c0 = arith.constant 0 : index
    %c0_0 = arith.constant 0 : index
    %0 = vector.load %arg0[%c0, %c0_0] : memref<16x128xf32, #tpu.memory_space<vmem>>, vector<16x128xf32>
    %c0_1 = arith.constant 0 : index
    %c0_2 = arith.constant 0 : index
    %1 = vector.load %arg1[%c0_1, %c0_2] : memref<2x16xf32, #tpu.memory_space<vmem>>, vector<2x16xf32>
    %2 = tpu.iota {dimensions = array<i32: 0>} : vector<16x1xi32>
    %c8_i32 = arith.constant 8 : i32
    %3 = vector.broadcast %c8_i32 : i32 to vector<16x1xi32>
    %4 = arith.cmpi slt, %2, %3 : vector<16x1xi32>
    %c0_3 = arith.constant 0 : index
    %c0_4 = arith.constant 0 : index
    %5 = vector.load %arg2[%c0_3, %c0_4] : memref<128x128xbf16, #tpu.memory_space<vmem>>, vector<128x128xbf16>
    %c0_5 = arith.constant 0 : index
    %c0_6 = arith.constant 0 : index
    %6 = vector.load %arg3[%c0_5, %c0_6] : memref<1x128xf32, #tpu.memory_space<vmem>>, vector<1x128xf32>
    %c0_7 = arith.constant 0 : index
    %c0_8 = arith.constant 0 : index
    %7 = vector.load %arg4[%c0_7, %c0_8] : memref<1x128xf32, #tpu.memory_space<vmem>>, vector<1x128xf32>
    %c0_9 = arith.constant 0 : index
    %c0_10 = arith.constant 0 : index
    %8 = vector.load %arg5[%c0_9, %c0_10] : memref<1x128xf32, #tpu.memory_space<vmem>>, vector<1x128xf32>
    %cst = arith.constant dense<0.000000e+00> : vector<2x128xf32>
    %9 = tpu.matmul %1, %0, %cst {dimension_numbers = #tpu.dot_dimension_numbers<[1], [0], [0], [1], [0, 0, 1, 1], [], []>} : vector<2x16xf32>, vector<16x128xf32>, vector<2x128xf32> -> vector<2x128xf32>
    %10 = arith.mulf %0, %0 : vector<16x128xf32>
    %cst_11 = arith.constant dense<0.000000e+00> : vector<2x128xf32>
    %11 = tpu.matmul %1, %10, %cst_11 {dimension_numbers = #tpu.dot_dimension_numbers<[1], [0], [0], [1], [0, 0, 1, 1], [], []>} : vector<2x16xf32>, vector<16x128xf32>, vector<2x128xf32> -> vector<2x128xf32>
    %12 = vector.extract_strided_slice %9 {offsets = [0, 0], sizes = [1, 128], strides = [1, 1]} : vector<2x128xf32> to vector<1x128xf32>
    %13 = vector.extract_strided_slice %9 {offsets = [1, 0], sizes = [1, 128], strides = [1, 1]} : vector<2x128xf32> to vector<1x128xf32>
    %14 = vector.shape_cast %4 : vector<16x1xi1> to vector<16x1xi1>
    %15 = vector.broadcast %14 : vector<16x1xi1> to vector<16x128xi1>
    %16 = vector.shape_cast %12 : vector<1x128xf32> to vector<1x128xf32>
    %17 = vector.broadcast %16 : vector<1x128xf32> to vector<16x128xf32>
    %18 = vector.shape_cast %13 : vector<1x128xf32> to vector<1x128xf32>
    %19 = vector.broadcast %18 : vector<1x128xf32> to vector<16x128xf32>
    %20 = arith.select %15, %17, %19 : vector<16x128xi1>, vector<16x128xf32>
    %21 = vector.extract_strided_slice %11 {offsets = [0, 0], sizes = [1, 128], strides = [1, 1]} : vector<2x128xf32> to vector<1x128xf32>
    %22 = vector.extract_strided_slice %11 {offsets = [1, 0], sizes = [1, 128], strides = [1, 1]} : vector<2x128xf32> to vector<1x128xf32>
    %23 = vector.shape_cast %4 : vector<16x1xi1> to vector<16x1xi1>
    %24 = vector.broadcast %23 : vector<16x1xi1> to vector<16x128xi1>
    %25 = vector.shape_cast %21 : vector<1x128xf32> to vector<1x128xf32>
    %26 = vector.broadcast %25 : vector<1x128xf32> to vector<16x128xf32>
    %27 = vector.shape_cast %22 : vector<1x128xf32> to vector<1x128xf32>
    %28 = vector.broadcast %27 : vector<1x128xf32> to vector<16x128xf32>
    %29 = arith.select %24, %26, %28 : vector<16x128xi1>, vector<16x128xf32>
    %30 = arith.mulf %20, %20 : vector<16x128xf32>
    %31 = arith.subf %29, %30 : vector<16x128xf32>
    %cst_12 = arith.constant 0.000000e+00 : f32
    %32 = vector.broadcast %cst_12 : f32 to vector<16x128xf32>
    %33 = arith.maximumf %31, %32 : vector<16x128xf32>
    %34 = arith.subf %0, %20 : vector<16x128xf32>
    %cst_13 = arith.constant 9.99999974E-6 : f32
    %35 = vector.broadcast %cst_13 : f32 to vector<16x128xf32>
    %36 = arith.addf %33, %35 : vector<16x128xf32>
    %37 = math.rsqrt %36 : vector<16x128xf32>
    %38 = arith.mulf %34, %37 : vector<16x128xf32>
    %39 = vector.broadcast %7 : vector<1x128xf32> to vector<16x128xf32>
    %40 = arith.mulf %38, %39 : vector<16x128xf32>
    %41 = vector.broadcast %8 : vector<1x128xf32> to vector<16x128xf32>
    %42 = arith.addf %40, %41 : vector<16x128xf32>
    %43 = arith.truncf %42 : vector<16x128xf32> to vector<16x128xbf16>
    %cst_14 = arith.constant dense<0.000000e+00> : vector<16x128xf32>
    %44 = tpu.matmul %43, %5, %cst_14 {dimension_numbers = #tpu.dot_dimension_numbers<[1], [0], [0], [1], [0, 0, 1, 1], [], []>} : vector<16x128xbf16>, vector<128x128xbf16>, vector<16x128xf32> -> vector<16x128xf32>
    %45 = vector.broadcast %6 : vector<1x128xf32> to vector<16x128xf32>
    %46 = arith.addf %44, %45 : vector<16x128xf32>
    %47 = math.tanh %46 : vector<16x128xf32>
    %c0_15 = arith.constant 0 : index
    %c0_16 = arith.constant 0 : index
    %48 = vector.load %arg6[%c0_15, %c0_16] : memref<128x128xbf16, #tpu.memory_space<vmem>>, vector<128x128xbf16>
    %c0_17 = arith.constant 0 : index
    %c0_18 = arith.constant 0 : index
    %49 = vector.load %arg7[%c0_17, %c0_18] : memref<1x128xf32, #tpu.memory_space<vmem>>, vector<1x128xf32>
    %c0_19 = arith.constant 0 : index
    %c0_20 = arith.constant 0 : index
    %50 = vector.load %arg8[%c0_19, %c0_20] : memref<1x128xf32, #tpu.memory_space<vmem>>, vector<1x128xf32>
    %c0_21 = arith.constant 0 : index
    %c0_22 = arith.constant 0 : index
    %51 = vector.load %arg9[%c0_21, %c0_22] : memref<1x128xf32, #tpu.memory_space<vmem>>, vector<1x128xf32>
    %cst_23 = arith.constant dense<0.000000e+00> : vector<2x128xf32>
    %52 = tpu.matmul %1, %47, %cst_23 {dimension_numbers = #tpu.dot_dimension_numbers<[1], [0], [0], [1], [0, 0, 1, 1], [], []>} : vector<2x16xf32>, vector<16x128xf32>, vector<2x128xf32> -> vector<2x128xf32>
    %53 = arith.mulf %47, %47 : vector<16x128xf32>
    %cst_24 = arith.constant dense<0.000000e+00> : vector<2x128xf32>
    %54 = tpu.matmul %1, %53, %cst_24 {dimension_numbers = #tpu.dot_dimension_numbers<[1], [0], [0], [1], [0, 0, 1, 1], [], []>} : vector<2x16xf32>, vector<16x128xf32>, vector<2x128xf32> -> vector<2x128xf32>
    %55 = vector.extract_strided_slice %52 {offsets = [0, 0], sizes = [1, 128], strides = [1, 1]} : vector<2x128xf32> to vector<1x128xf32>
    %56 = vector.extract_strided_slice %52 {offsets = [1, 0], sizes = [1, 128], strides = [1, 1]} : vector<2x128xf32> to vector<1x128xf32>
    %57 = vector.shape_cast %4 : vector<16x1xi1> to vector<16x1xi1>
    %58 = vector.broadcast %57 : vector<16x1xi1> to vector<16x128xi1>
    %59 = vector.shape_cast %55 : vector<1x128xf32> to vector<1x128xf32>
    %60 = vector.broadcast %59 : vector<1x128xf32> to vector<16x128xf32>
    %61 = vector.shape_cast %56 : vector<1x128xf32> to vector<1x128xf32>
    %62 = vector.broadcast %61 : vector<1x128xf32> to vector<16x128xf32>
    %63 = arith.select %58, %60, %62 : vector<16x128xi1>, vector<16x128xf32>
    %64 = vector.extract_strided_slice %54 {offsets = [0, 0], sizes = [1, 128], strides = [1, 1]} : vector<2x128xf32> to vector<1x128xf32>
    %65 = vector.extract_strided_slice %54 {offsets = [1, 0], sizes = [1, 128], strides = [1, 1]} : vector<2x128xf32> to vector<1x128xf32>
    %66 = vector.shape_cast %4 : vector<16x1xi1> to vector<16x1xi1>
    %67 = vector.broadcast %66 : vector<16x1xi1> to vector<16x128xi1>
    %68 = vector.shape_cast %64 : vector<1x128xf32> to vector<1x128xf32>
    %69 = vector.broadcast %68 : vector<1x128xf32> to vector<16x128xf32>
    %70 = vector.shape_cast %65 : vector<1x128xf32> to vector<1x128xf32>
    %71 = vector.broadcast %70 : vector<1x128xf32> to vector<16x128xf32>
    %72 = arith.select %67, %69, %71 : vector<16x128xi1>, vector<16x128xf32>
    %73 = arith.mulf %63, %63 : vector<16x128xf32>
    %74 = arith.subf %72, %73 : vector<16x128xf32>
    %cst_25 = arith.constant 0.000000e+00 : f32
    %75 = vector.broadcast %cst_25 : f32 to vector<16x128xf32>
    %76 = arith.maximumf %74, %75 : vector<16x128xf32>
    %77 = arith.subf %47, %63 : vector<16x128xf32>
    %cst_26 = arith.constant 9.99999974E-6 : f32
    %78 = vector.broadcast %cst_26 : f32 to vector<16x128xf32>
    %79 = arith.addf %76, %78 : vector<16x128xf32>
    %80 = math.rsqrt %79 : vector<16x128xf32>
    %81 = arith.mulf %77, %80 : vector<16x128xf32>
    %82 = vector.broadcast %50 : vector<1x128xf32> to vector<16x128xf32>
    %83 = arith.mulf %81, %82 : vector<16x128xf32>
    %84 = vector.broadcast %51 : vector<1x128xf32> to vector<16x128xf32>
    %85 = arith.addf %83, %84 : vector<16x128xf32>
    %86 = arith.truncf %85 : vector<16x128xf32> to vector<16x128xbf16>
    %cst_27 = arith.constant dense<0.000000e+00> : vector<16x128xf32>
    %87 = tpu.matmul %86, %48, %cst_27 {dimension_numbers = #tpu.dot_dimension_numbers<[1], [0], [0], [1], [0, 0, 1, 1], [], []>} : vector<16x128xbf16>, vector<128x128xbf16>, vector<16x128xf32> -> vector<16x128xf32>
    %88 = vector.broadcast %49 : vector<1x128xf32> to vector<16x128xf32>
    %89 = arith.addf %87, %88 : vector<16x128xf32>
    %90 = math.tanh %89 : vector<16x128xf32>
    %c0_28 = arith.constant 0 : index
    %c0_29 = arith.constant 0 : index
    %91 = vector.load %arg10[%c0_28, %c0_29] : memref<16x128xf32, #tpu.memory_space<vmem>>, vector<16x128xf32>
    tpu.vector_store %arg10[%c0_28, %c0_29], %90 {strides = array<i32>} : memref<16x128xf32, #tpu.memory_space<vmem>>, vector<16x128xf32>,
    return
  }
}

module attributes {stable_mosaic.version = 11 : i64} {
  func.func @_nona_head_kernel(%arg0: i32, %arg1: i32, %arg2: memref<128x128xf32, #tpu.memory_space<vmem>>, %arg3: memref<128x128xf32, #tpu.memory_space<vmem>>, %arg4: memref<2x128xf32, #tpu.memory_space<vmem>>, %arg5: memref<1x1x128xf32, #tpu.memory_space<vmem>>, %arg6: memref<1x128xf32, #tpu.memory_space<vmem>>, %arg7: memref<2x128xf32, #tpu.memory_space<vmem>>) attributes {dimension_semantics = [#tpu.dimension_semantics<parallel>, #tpu.dimension_semantics<arbitrary>], iteration_bounds = array<i64: 1, 1>, scalar_prefetch = 0 : i64, scratch_operands = 2 : i64, tpu.core_type = #tpu.core_type<tc>, window_params = [{transform_indices = @transform_0, window_bounds = array<i64: 128, 128>}, {transform_indices = @transform_1, window_bounds = array<i64: 128, 128>}, {transform_indices = @transform_2, window_bounds = array<i64: 2, 128>}, {transform_indices = @transform_3, window_bounds = array<i64: 1, 1, 128>}]} {
    %c0_i32 = arith.constant 0 : i32
    %0 = arith.cmpi eq, %arg1, %c0_i32 : i32
    %1 = arith.extui %0 : i1 to i32
    %c0_i32_0 = arith.constant 0 : i32
    %2 = arith.cmpi ne, %1, %c0_i32_0 : i32
    scf.if %2 {
      %cst_27 = arith.constant -1.000000e+30 : f32
      %55 = vector.broadcast %cst_27 : f32 to vector<1x128xf32>
      %c0_28 = arith.constant 0 : index
      %c0_29 = arith.constant 0 : index
      %56 = vector.load %arg6[%c0_28, %c0_29] : memref<1x128xf32, #tpu.memory_space<vmem>>, vector<1x128xf32>
      tpu.vector_store %arg6[%c0_28, %c0_29], %55 {strides = array<i32>} : memref<1x128xf32, #tpu.memory_space<vmem>>, vector<1x128xf32>,
      %cst_30 = arith.constant 0.000000e+00 : f32
      %57 = vector.broadcast %cst_30 : f32 to vector<2x128xf32>
      %c0_31 = arith.constant 0 : index
      %c0_32 = arith.constant 0 : index
      %58 = vector.load %arg7[%c0_31, %c0_32] : memref<2x128xf32, #tpu.memory_space<vmem>>, vector<2x128xf32>
      tpu.vector_store %arg7[%c0_31, %c0_32], %57 {strides = array<i32>} : memref<2x128xf32, #tpu.memory_space<vmem>>, vector<2x128xf32>,
    } else {
    }
    %c0 = arith.constant 0 : index
    %c0_1 = arith.constant 0 : index
    %3 = vector.load %arg2[%c0, %c0_1] : memref<128x128xf32, #tpu.memory_space<vmem>>, vector<128x128xf32>
    %c0_2 = arith.constant 0 : index
    %c0_3 = arith.constant 0 : index
    %4 = vector.load %arg3[%c0_2, %c0_3] : memref<128x128xf32, #tpu.memory_space<vmem>>, vector<128x128xf32>
    %cst = arith.constant 1.000000e+00 : f32
    %5 = vector.broadcast %cst : f32 to vector<1x128xf32>
    %6 = arith.mulf %3, %3 : vector<128x128xf32>
    %cst_4 = arith.constant dense<0.000000e+00> : vector<1x128xf32>
    %7 = tpu.matmul %5, %6, %cst_4 {dimension_numbers = #tpu.dot_dimension_numbers<[1], [1], [0], [0], [0, 0, 1, 0], [], []>} : vector<1x128xf32>, vector<128x128xf32>, vector<1x128xf32> -> vector<1x128xf32>
    %8 = arith.mulf %4, %4 : vector<128x128xf32>
    %cst_5 = arith.constant dense<0.000000e+00> : vector<128x1xf32>
    %9 = tpu.matmul %8, %5, %cst_5 {dimension_numbers = #tpu.dot_dimension_numbers<[1], [1], [0], [0], [0, 0, 1, 0], [], []>} : vector<128x128xf32>, vector<1x128xf32>, vector<128x1xf32> -> vector<128x1xf32>
    %10 = arith.truncf %4 : vector<128x128xf32> to vector<128x128xbf16>
    %11 = arith.truncf %3 : vector<128x128xf32> to vector<128x128xbf16>
    %cst_6 = arith.constant dense<0.000000e+00> : vector<128x128xf32>
    %12 = tpu.matmul %10, %11, %cst_6 {dimension_numbers = #tpu.dot_dimension_numbers<[1], [1], [0], [0], [0, 0, 1, 0], [], []>} : vector<128x128xbf16>, vector<128x128xbf16>, vector<128x128xf32> -> vector<128x128xf32>
    %13 = vector.broadcast %9 : vector<128x1xf32> to vector<128x128xf32>
    %14 = vector.broadcast %7 : vector<1x128xf32> to vector<128x128xf32>
    %15 = arith.addf %13, %14 : vector<128x128xf32>
    %cst_7 = arith.constant 2.000000e+00 : f32
    %16 = vector.broadcast %cst_7 : f32 to vector<128x128xf32>
    %17 = arith.mulf %16, %12 : vector<128x128xf32>
    %18 = arith.subf %15, %17 : vector<128x128xf32>
    %cst_8 = arith.constant 0.000000e+00 : f32
    %19 = vector.broadcast %cst_8 : f32 to vector<128x128xf32>
    %20 = arith.maximumf %18, %19 : vector<128x128xf32>
    %21 = math.sqrt %20 : vector<128x128xf32>
    %cst_9 = arith.constant 0.000000e+00 : f32
    %22 = vector.broadcast %cst_9 : f32 to vector<128x128xf32>
    %23 = arith.subf %22, %21 : vector<128x128xf32>
    %24 = tpu.iota {dimensions = array<i32: 0>} : vector<128x128xi32>
    %c128_i32 = arith.constant 128 : i32
    %25 = arith.muli %arg1, %c128_i32 : i32
    %26 = vector.broadcast %25 : i32 to vector<128x128xi32>
    %27 = arith.addi %24, %26 : vector<128x128xi32>
    %c8_i32 = arith.constant 8 : i32
    %28 = vector.broadcast %c8_i32 : i32 to vector<128x128xi32>
    %29 = arith.cmpi sge, %27, %28 : vector<128x128xi32>
    %cst_10 = arith.constant -1.000000e+30 : f32
    %30 = vector.broadcast %cst_10 : f32 to vector<128x128xf32>
    %31 = arith.select %29, %30, %23 : vector<128x128xi1>, vector<128x128xf32>
    %cst_11 = arith.constant dense<0xFF800000> : vector<128xf32>
    %32 = vector.multi_reduction <maximumf>, %31, %cst_11 [0] : vector<128x128xf32> to vector<128xf32>
    %33 = vector.shape_cast %32 : vector<128xf32> to vector<1x128xf32>
    %c0_12 = arith.constant 0 : index
    %c0_13 = arith.constant 0 : index
    %34 = vector.load %arg6[%c0_12, %c0_13] : memref<1x128xf32, #tpu.memory_space<vmem>>, vector<1x128xf32>
    %35 = arith.maximumf %34, %33 : vector<1x128xf32>
    %c0_14 = arith.constant 0 : index
    %c0_15 = arith.constant 0 : index
    %36 = vector.load %arg6[%c0_14, %c0_15] : memref<1x128xf32, #tpu.memory_space<vmem>>, vector<1x128xf32>
    %37 = arith.subf %36, %35 : vector<1x128xf32>
    %38 = math.exp %37 : vector<1x128xf32>
    %39 = vector.broadcast %35 : vector<1x128xf32> to vector<128x128xf32>
    %40 = arith.subf %31, %39 : vector<128x128xf32>
    %41 = math.exp %40 : vector<128x128xf32>
    %c0_16 = arith.constant 0 : index
    %c0_17 = arith.constant 0 : index
    %42 = vector.load %arg4[%c0_16, %c0_17] : memref<2x128xf32, #tpu.memory_space<vmem>>, vector<2x128xf32>
    %43 = arith.truncf %42 : vector<2x128xf32> to vector<2x128xbf16>
    %44 = arith.truncf %41 : vector<128x128xf32> to vector<128x128xbf16>
    %cst_18 = arith.constant dense<0.000000e+00> : vector<2x128xf32>
    %45 = tpu.matmul %43, %44, %cst_18 {dimension_numbers = #tpu.dot_dimension_numbers<[1], [0], [0], [1], [0, 0, 1, 1], [], []>} : vector<2x128xbf16>, vector<128x128xbf16>, vector<2x128xf32> -> vector<2x128xf32>
    %c0_19 = arith.constant 0 : index
    %c0_20 = arith.constant 0 : index
    %46 = vector.load %arg7[%c0_19, %c0_20] : memref<2x128xf32, #tpu.memory_space<vmem>>, vector<2x128xf32>
    %47 = vector.broadcast %38 : vector<1x128xf32> to vector<2x128xf32>
    %48 = arith.mulf %47, %46 : vector<2x128xf32>
    %49 = arith.addf %48, %45 : vector<2x128xf32>
    %c0_21 = arith.constant 0 : index
    %c0_22 = arith.constant 0 : index
    %50 = vector.load %arg7[%c0_21, %c0_22] : memref<2x128xf32, #tpu.memory_space<vmem>>, vector<2x128xf32>
    tpu.vector_store %arg7[%c0_21, %c0_22], %49 {strides = array<i32>} : memref<2x128xf32, #tpu.memory_space<vmem>>, vector<2x128xf32>,
    %c0_23 = arith.constant 0 : index
    %c0_24 = arith.constant 0 : index
    %51 = vector.load %arg6[%c0_23, %c0_24] : memref<1x128xf32, #tpu.memory_space<vmem>>, vector<1x128xf32>
    tpu.vector_store %arg6[%c0_23, %c0_24], %35 {strides = array<i32>} : memref<1x128xf32, #tpu.memory_space<vmem>>, vector<1x128xf32>,
    %c0_i32_25 = arith.constant 0 : i32
    %52 = arith.cmpi eq, %arg1, %c0_i32_25 : i32
    %53 = arith.extui %52 : i1 to i32
    %c0_i32_26 = arith.constant 0 : i32
    %54 = arith.cmpi ne, %53, %c0_i32_26 : i32
    scf.if %54 {
      %c0_27 = arith.constant 0 : index
      %c0_28 = arith.constant 0 : index
      %55 = vector.load %arg7[%c0_27, %c0_28] : memref<2x128xf32, #tpu.memory_space<vmem>>, vector<1x128xf32>
      %c1 = arith.constant 1 : index
      %c0_29 = arith.constant 0 : index
      %56 = vector.load %arg7[%c1, %c0_29] : memref<2x128xf32, #tpu.memory_space<vmem>>, vector<1x128xf32>
      %57 = tpu.reciprocal %56 {approx = true} : vector<1x128xf32> -> vector<1x128xf32>
      %58 = arith.mulf %55, %57 : vector<1x128xf32>
      %cst_30 = arith.constant 0.000000e+00 : f32
      %cst_31 = arith.constant 1.000000e+00 : f32
      %59 = vector.broadcast %cst_30 : f32 to vector<1x128xf32>
      %60 = arith.maximumf %59, %58 : vector<1x128xf32>
      %61 = vector.broadcast %cst_31 : f32 to vector<1x128xf32>
      %62 = arith.minimumf %61, %60 : vector<1x128xf32>
      %c0_32 = arith.constant 0 : index
      %c0_33 = arith.constant 0 : index
      %c0_34 = arith.constant 0 : index
      %63 = vector.load %arg5[%c0_32, %c0_33, %c0_34] : memref<1x1x128xf32, #tpu.memory_space<vmem>>, vector<1x1x128xf32>
      %64 = vector.shape_cast %63 : vector<1x1x128xf32> to vector<1x128xf32>
      %65 = vector.shape_cast %62 : vector<1x128xf32> to vector<1x1x128xf32>
      tpu.vector_store %arg5[%c0_32, %c0_33, %c0_34], %65 {strides = array<i32>} : memref<1x1x128xf32, #tpu.memory_space<vmem>>, vector<1x1x128xf32>,
    } else {
    }
    return
  }
  func.func @transform_0(%arg0: i32, %arg1: i32) -> (i32, i32) {
    %c0_i32 = arith.constant 0 : i32
    %c0_i32_0 = arith.constant 0 : i32
    return %arg0, %c0_i32 : i32, i32
  }
  func.func @transform_1(%arg0: i32, %arg1: i32) -> (i32, i32) {
    %c0_i32 = arith.constant 0 : i32
    %c0_i32_0 = arith.constant 0 : i32
    return %arg1, %c0_i32 : i32, i32
  }
  func.func @transform_2(%arg0: i32, %arg1: i32) -> (i32, i32) {
    %c0_i32 = arith.constant 0 : i32
    %c0_i32_0 = arith.constant 0 : i32
    return %c0_i32, %arg1 : i32, i32
  }
  func.func @transform_3(%arg0: i32, %arg1: i32) -> (i32, i32, i32) {
    %c0_i32 = arith.constant 0 : i32
    %c0_i32_0 = arith.constant 0 : i32
    %c0_i32_1 = arith.constant 0 : i32
    return %arg0, %c0_i32, %c0_i32_0 : i32, i32, i32
  }
}

</mosaic_0001>

<bundles_post_ra>
// kernel: _forward_impl.2
= control target key start
LH: loop header
LB: loop body
LE: loop exit
PB: predicated region body
PF: predicated region fallthrough
CT: control target
= control target key end

     0   :  { %15 = vsyncpa [#allocation3], 0  ;;  %s1088_s0 = inlined_call_operand.vmem [shape: f32[16,128], index: 0, kind: input, shape index: {}]   ;;  %s1089_s1 = inlined_call_operand.vmem [shape: f32[2,16], index: 1, kind: input, shape index: {}]   ;;  %s1090_s2 = inlined_call_operand.hbm [shape: bf16[128,128], index: 2, kind: input, shape index: {}]   ;;  %s1091_s3 = inlined_call_operand.vmem [shape: f32[1,128], index: 3, kind: input, shape index: {}]   ;;  %s1092_s4 = inlined_call_operand.vmem [shape: f32[1,128], index: 4, kind: input, shape index: {}]   ;;  %s1093_s5 = inlined_call_operand.vmem [shape: f32[1,128], index: 5, kind: input, shape index: {}]   ;;  %s1094_s6 = inlined_call_operand.hbm [shape: bf16[128,128], index: 6, kind: input, shape index: {}]   ;;  %s1095_s7 = inlined_call_operand.vmem [shape: f32[1,128], index: 7, kind: input, shape index: {}]   ;;  %s1096_s8 = inlined_call_operand.vmem [shape: f32[1,128], index: 8, kind: input, shape index: {}]   ;;  %s1097_s9 = inlined_call_operand.vmem [shape: f32[1,128], index: 9, kind: input, shape index: {}]   ;;  %s1098_s10 = inlined_call_operand.vmem [shape: f32[16,128], index: 10, kind: output, shape index: {}]  }
   0x1   :  { %16 = vsyncpa [#allocation5], 0  ;;  %s912_s13 = smov [#allocation2]  }
   0x2   :  { %s26_s14 = sshll.u32 %s912_s13, 4  ;;  %s27_s14 = int_to_ptr.vmem [resolvable:$true] %s26_s14 }
   0x3   :  { %s876_s15 = scalar_lea.vmem %s27_s14, 1024  ;;  %p881_p1 = scmp.lt.s32.totalorder %s27_s14, %s27_s14 }
   0x4   :  { %p877_p0 = scmp.ne.s32.totalorder %s27_s14, %s876_s15  ;;  %p882_p2 = scmp.lt.s32.totalorder %s876_s15, %s876_s15 }
   0x6   :  { %p883_p3 = por %p882_p2, %p881_p1 }
   0x8   :  { %p884_p4 = pnand %p883_p3, %p877_p0 }
   0xa   :  { %887 = shalt.err (!%p884_p4)
}
   0xb   :  { %s913_s16 = smov 64   ;;  %s914_s17 = smov 4  }
   0xc   :  { %32 = dma.hbm_to_vmem [thread:$0]  %s1090_s2, 1024, %s27_s14, [#allocation3], %s913_s16, %s913_s16, %s914_s17  }
   0xd   :  { %s915_s20 = smov [#allocation4]  }
   0xe   :  { %s44_s21 = sshll.u32 %s915_s20, 4  ;;  %s45_s21 = int_to_ptr.vmem [resolvable:$true] %s44_s21 }
   0xf   :  { %s896_s22 = scalar_lea.vmem %s45_s21, 1024  ;;  %p901_p6 = scmp.lt.s32.totalorder %s45_s21, %s45_s21 }
  0x10   :  { %p897_p5 = scmp.ne.s32.totalorder %s45_s21, %s896_s22  ;;  %p902_p7 = scmp.lt.s32.totalorder %s896_s22, %s896_s22 }
  0x12   :  { %p903_p8 = por %p902_p7, %p901_p6 }
  0x14   :  { %p904_p9 = pnand %p903_p8, %p897_p5 }
  0x16   :  { %907 = shalt.err (!%p904_p9)
}
  0x17   :  { %50 = dma.hbm_to_vmem [thread:$0]  %s1094_s6, 1024, %s45_s21, [#allocation5], %s913_s16, %s913_s16, %s914_s17  }
  0x18   :  { %908 = dma.done.wait [#allocation3], 1024  }
  0x19   :  { %909 = vsyncadd [#allocation3], 4294966272 }
  0x1a   :  { %910 = dma.done.wait [#allocation5], 1024  }
  0x1b   :  { %911 = vsyncadd [#allocation5], 4294966272  ;;  %v916_v0 = vmov 0.0   ;;  %vm917_vm0 = vmmov 0   ;;  %v988_v1 = vld [vmem:[%s1088_s0 + $0x8] sm:$0xff]  ;;  %v993_v2 = vld [vmem:[%s1088_s0] sm:$0xff]  ;;  %v241_v14 = vlaneseq }
  0x1c   :  { %762 = vmatprep.subr.mxu0 %v916_v0  ;;  %766 = vmatprep.mubr.msk.f32.mxu0 %vm917_vm0, %v916_v0  ;;  %v998_v3 = vld [vmem:[%s1089_s1] sm:$0x3]  ;;  %vm91_vm1 = vcmask 130048   ;;  %v166_v4 = vmul.f32 %v988_v1, %v988_v1  ;;  %v165_v5 = vmul.f32 %v993_v2, %v993_v2  ;;  %v836_v6 = vld [vmem:[#allocation2 + $0x38] sm:$0xff]   ;;  %v837_v7 = vld [vmem:[#allocation2 + $0x30] sm:$0xff]  }
  0x1d   :  { %796 = vmatprep.subr.mxu1 %v916_v0  ;;  %800 = vmatprep.mubr.msk.f32.mxu1 %vm917_vm0, %v916_v0  ;;  %v838_v8 = vld [vmem:[#allocation2 + $0x28] sm:$0xff]   ;;  %v839_v9 = vld [vmem:[#allocation2 + $0x20] sm:$0xff]   ;;  %v840_v10 = vld [vmem:[#allocation2 + $0x18] sm:$0xff]   ;;  %v242_v15 = vshrl.u32 %v241_v14, 7 }
  0x1e   :  { %763 = vmatpush3.msra.mxu0 %v988_v1  ;;  %v841_v11 = vld [vmem:[#allocation2 + $0x10] sm:$0xff]   ;;  %v842_v12 = vld [vmem:[#allocation2 + $0x8] sm:$0xff]   ;;  %v843_v13 = vld [vmem:[#allocation2] sm:$0xff]  }
  0x1f   :  { %764 = vmatprep.subr.mxu0 %v916_v0  ;;  %v1025_v16 = vsub.s32 0, %v242_v15  ;;  %v1027_v17 = vsub.s32 1, %v242_v15  ;;  %v708_v37 = vld [vmem:[%s1092_s4] ss:$0 sm:$0xff]  ;;  %v844_v58 = vld [vmem:[#allocation4 + $0x38] sm:$0xff]   ;;  %v845_v59 = vld [vmem:[#allocation4 + $0x30] sm:$0xff]  }
  0x20   :  { %765 = vmatpush3.msra.mxu0 %v993_v2  ;;  %v709_v40 = vld [vmem:[%s1093_s5] ss:$0 sm:$0xff]  ;;  %v846_v60 = vld [vmem:[#allocation4 + $0x28] sm:$0xff]   ;;  %v848_v62 = vld [vmem:[#allocation4 + $0x18] sm:$0xff]  }
  0x21   :  { %767 = vmatmul.mubr.msk.f32.vlgmr.msra.gmra.mxu0 %vm91_vm1, %v998_v3  ;;  %769 = vmatprep.subr.mxu0 %v916_v0  ;;  %v710_v48 = vld [vmem:[%s1091_s3] ss:$0 sm:$0xff]  ;;  %v849_v63 = vld [vmem:[#allocation4 + $0x10] sm:$0xff]  }
  0x22   :  { %770 = vmatpush3.msra.mxu0 %v166_v4  ;;  %773 = vmatprep.mubr.msk.f32.mxu0 %vm917_vm0, %v916_v0  ;;  %v847_v61 = vld [vmem:[#allocation4 + $0x20] sm:$0xff]  }
  0x23   :  { %771 = vmatprep.subr.mxu0 %v916_v0 }
  0x24   :  { %772 = vmatpush3.msra.mxu0 %v165_v5 }
  0x25   :  { %774 = vmatmul.mubr.msk.f32.vlgmr.msra.gmra.mxu0 %vm91_vm1, %v998_v3  ;;  %776 = vmatprep.subr.bf16.mxu0 %v916_v0 }
  0x26   :  { %792 = vmatprep.mubr.msk.bf16.mxu0 %vm917_vm0, %v916_v0  ;;  %777 = vmatpush3.bf16.msra.mxu0 %v836_v6 }
  0x27   :  { %778 = vmatprep.subr.bf16.mxu0 %v916_v0 }
  0x2a   :  { %779 = vmatpush3.bf16.msra.mxu0 %v837_v7 }
  0x2b   :  { %780 = vmatprep.subr.bf16.mxu0 %v916_v0 }
  0x2e   :  { %781 = vmatpush3.bf16.msra.mxu0 %v838_v8 }
  0x2f   :  { %782 = vmatprep.subr.bf16.mxu0 %v916_v0 }
  0x32   :  { %783 = vmatpush3.bf16.msra.mxu0 %v839_v9 }
  0x33   :  { %784 = vmatprep.subr.bf16.mxu0 %v916_v0 }
  0x36   :  { %785 = vmatpush3.bf16.msra.mxu0 %v840_v10 }
  0x37   :  { %786 = vmatprep.subr.bf16.mxu0 %v916_v0 }
  0x3a   :  { %787 = vmatpush3.bf16.msra.mxu0 %v841_v11 }
  0x3b   :  { %788 = vmatprep.subr.bf16.mxu0 %v916_v0 }
  0x3e   :  { %789 = vmatpush3.bf16.msra.mxu0 %v842_v12 }
  0x3f   :  { %790 = vmatprep.subr.bf16.mxu0 %v916_v0 }
  0x42   :  { %791 = vmatpush3.bf16.msra.mxu0 %v843_v13 }
  0xe1   :  { %v161_v18 = vpop.f32.mrf.mxu0 }
  0xe2   :  { %v244_v19 = vrot.slane %v161_v18, %v1025_v16  ;;  %v248_v20 = vrot.slane %v161_v18, %v1027_v17 }
  0xe3   :  { %v768_v21 = vpop.f32.mrf.mxu0 }
  0xe4   :  { %v261_v23 = vmul.f32 %v244_v19, %v244_v19  ;;  %v262_v24 = vmul.f32 %v248_v20, %v248_v20  ;;  %v267_v34 = vsub.f32 %v993_v2, %v244_v19  ;;  %v268_v36 = vsub.f32 %v988_v1, %v248_v20  ;;  %v850_v1 = vld [vmem:[#allocation4 + $0x8] sm:$0xff]   ;;  %v851_v2 = vld [vmem:[#allocation4] sm:$0xff]  }
  0xe5   :  { %v233_v22 = vpop.f32.mrf.mxu0 }
  0xe6   :  { %v254_v25 = vrot.slane %v233_v22, %v1025_v16  ;;  %v258_v26 = vrot.slane %v233_v22, %v1027_v17 }
  0xe7   :  { %v775_v27 = vpop.f32.mrf.mxu0 }
  0xe8   :  { %v263_v28 = vsub.f32 %v254_v25, %v261_v23  ;;  %v264_v29 = vsub.f32 %v258_v26, %v262_v24  ;;  %v721_v23 = vld [vmem:[%s1096_s8] ss:$0 sm:$0xff] }
  0xea   :  { %v265_v30 = vmax.f32 %v263_v28, 0.0  ;;  %v266_v31 = vmax.f32 %v264_v29, 0.0 }
  0xec   :  { %v269_v32 = vadd.f32 1e-05, %v265_v30  ;;  %v270_v33 = vadd.f32 1e-05, %v266_v31  ;;  %v723_v31 = vld [vmem:[%s1095_s7] ss:$0 sm:$0xff] }
  0xee   :  { %852 = vrsqrt.f32 %v269_v32 }
  0xef   :  { %854 = vrsqrt.f32 %v270_v33 }
  0xfb   :  { %v853_v35 = vpop.eup %852 }
  0xfc   :  { %v855_v38 = vpop.eup %854  ;;  %v273_v39 = vmul.f32 %v853_v35, %v267_v34 }
  0xfd   :  { %v274_v41 = vmul.f32 %v855_v38, %v268_v36 }
  0xfe   :  { %v281_v42 = vmul.f32 %v708_v37, %v273_v39 }
  0xff   :  { %v282_v43 = vmul.f32 %v708_v37, %v274_v41 }
 0x100   :  { %v289_v44 = vadd.f32 %v709_v40, %v281_v42 }
 0x101   :  { %v290_v45 = vadd.f32 %v709_v40, %v282_v43 }
 0x103   :  { %v291_v46 = vpack.c.bf16 %v290_v45, %v289_v44 }
 0x105   :  { %793 = vmatmul.mubr.bf16.vlgmr.msra.gmra.mxu0 %v291_v46 }
 0x1c5   :  { %v380_v47 = vpop.f32.mrf.mxu0 }
 0x1c6   :  { %v381_v51 = vadd.f32 %v710_v48, %v380_v47 }
 0x1c7   :  { %v794_v49 = vpop.f32.mrf.mxu0 }
 0x1c9   :  { %v383_v50 = vpop.f32.mrf.mxu0 }
 0x1ca   :  { %v384_v52 = vadd.f32 %v710_v48, %v383_v50 }
 0x1cb   :  { %v795_v53 = vpop.f32.mrf.mxu0 }
 0x1cc   :  { %856 = vtanh.f32 %v384_v52 }
 0x1cd   :  { %858 = vtanh.f32 %v381_v51 }
 0x1d9   :  { %v1044_v54 = vpop.eup %856 }
 0x1da   :  { %797 = vmatpush3.msra.mxu1 %v1044_v54  ;;  %v859_v55 = vpop.eup %858  ;;  %v479_v56 = vmul.f32 %v1044_v54, %v1044_v54 }
 0x1db   :  { %798 = vmatprep.subr.mxu1 %v916_v0  ;;  %v478_v57 = vmul.f32 %v859_v55, %v859_v55 }
 0x1dc   :  { %799 = vmatpush3.msra.mxu1 %v859_v55 }
 0x1dd   :  { %801 = vmatmul.mubr.msk.f32.vlgmr.msra.gmra.mxu1 %vm91_vm1, %v998_v3  ;;  %803 = vmatprep.subr.mxu1 %v916_v0 }
 0x1de   :  { %804 = vmatpush3.msra.mxu1 %v479_v56  ;;  %807 = vmatprep.mubr.msk.f32.mxu1 %vm917_vm0, %v916_v0 }
 0x1df   :  { %805 = vmatprep.subr.mxu1 %v916_v0 }
 0x1e0   :  { %806 = vmatpush3.msra.mxu1 %v478_v57 }
 0x1e1   :  { %808 = vmatmul.mubr.msk.f32.vlgmr.msra.gmra.mxu1 %vm91_vm1, %v998_v3  ;;  %810 = vmatprep.subr.bf16.mxu1 %v916_v0 }
 0x1e2   :  { %826 = vmatprep.mubr.msk.bf16.mxu1 %vm917_vm0, %v916_v0  ;;  %811 = vmatpush3.bf16.msra.mxu1 %v844_v58 }
 0x1e3   :  { %812 = vmatprep.subr.bf16.mxu1 %v916_v0 }
 0x1e6   :  { %813 = vmatpush3.bf16.msra.mxu1 %v845_v59 }
 0x1e7   :  { %814 = vmatprep.subr.bf16.mxu1 %v916_v0 }
 0x1ea   :  { %815 = vmatpush3.bf16.msra.mxu1 %v846_v60 }
 0x1eb   :  { %816 = vmatprep.subr.bf16.mxu1 %v916_v0 }
 0x1ee   :  { %817 = vmatpush3.bf16.msra.mxu1 %v847_v61 }
 0x1ef   :  { %818 = vmatprep.subr.bf16.mxu1 %v916_v0 }
 0x1f2   :  { %819 = vmatpush3.bf16.msra.mxu1 %v848_v62 }
 0x1f3   :  { %820 = vmatprep.subr.bf16.mxu1 %v916_v0 }
 0x1f6   :  { %821 = vmatpush3.bf16.msra.mxu1 %v849_v63 }
 0x1f7   :  { %822 = vmatprep.subr.bf16.mxu1 %v916_v0 }
 0x1fa   :  { %823 = vmatpush3.bf16.msra.mxu1 %v850_v1 }
 0x1fb   :  { %824 = vmatprep.subr.bf16.mxu1 %v916_v0 }
 0x1fe   :  { %825 = vmatpush3.bf16.msra.mxu1 %v851_v2 }
 0x29d   :  { %v474_v3 = vpop.f32.mrf.mxu1 }
 0x29e   :  { %v553_v4 = vrot.slane %v474_v3, %v1025_v16  ;;  %v557_v5 = vrot.slane %v474_v3, %v1027_v17 }
 0x29f   :  { %v802_v6 = vpop.f32.mrf.mxu1 }
 0x2a0   :  { %v570_v8 = vmul.f32 %v553_v4, %v553_v4  ;;  %v571_v9 = vmul.f32 %v557_v5, %v557_v5  ;;  %v576_v20 = vsub.f32 %v859_v55, %v553_v4  ;;  %v577_v22 = vsub.f32 %v1044_v54, %v557_v5 }
 0x2a1   :  { %v546_v7 = vpop.f32.mrf.mxu1 }
 0x2a2   :  { %v563_v10 = vrot.slane %v546_v7, %v1025_v16  ;;  %v567_v11 = vrot.slane %v546_v7, %v1027_v17  ;;  %v722_v17 = vld [vmem:[%s1097_s9] ss:$0 sm:$0xff] }
 0x2a3   :  { %v809_v12 = vpop.f32.mrf.mxu1 }
 0x2a4   :  { %v572_v13 = vsub.f32 %v563_v10, %v570_v8  ;;  %v573_v14 = vsub.f32 %v567_v11, %v571_v9 }
 0x2a6   :  { %v574_v15 = vmax.f32 %v572_v13, 0.0  ;;  %v575_v18 = vmax.f32 %v573_v14, 0.0 }
 0x2a8   :  { %v578_v0 = vadd.f32 1e-05, %v574_v15  ;;  %v579_v19 = vadd.f32 1e-05, %v575_v18 }
 0x2aa   :  { %860 = vrsqrt.f32 %v578_v0 }
 0x2ab   :  { %862 = vrsqrt.f32 %v579_v19 }
 0x2b7   :  { %v861_v21 = vpop.eup %860 }
 0x2b8   :  { %v863_v16 = vpop.eup %862  ;;  %v582_v24 = vmul.f32 %v861_v21, %v576_v20 }
 0x2b9   :  { %v583_v25 = vmul.f32 %v863_v16, %v577_v22 }
 0x2ba   :  { %v590_v26 = vmul.f32 %v721_v23, %v582_v24 }
 0x2bb   :  { %v591_v27 = vmul.f32 %v721_v23, %v583_v25 }
 0x2bc   :  { %v598_v28 = vadd.f32 %v722_v17, %v590_v26 }
 0x2bd   :  { %v599_v29 = vadd.f32 %v722_v17, %v591_v27 }
 0x2bf   :  { %v600_v30 = vpack.c.bf16 %v599_v29, %v598_v28 }
 0x2c1   :  { %827 = vmatmul.mubr.bf16.vlgmr.msra.gmra.mxu1 %v600_v30 }
 0x381   :  { %v689_v32 = vpop.f32.mrf.mxu1 }
 0x382   :  { %v690_v33 = vadd.f32 %v723_v31, %v689_v32 }
 0x383   :  { %v828_v34 = vpop.f32.mrf.mxu1 }
 0x384   :  { %864 = vtanh.f32 %v690_v33 }
 0x385   :  { %v692_v35 = vpop.f32.mrf.mxu1 }
 0x386   :  { %v693_v36 = vadd.f32 %v723_v31, %v692_v35 }
 0x387   :  { %v829_v37 = vpop.f32.mrf.mxu1 }
 0x388   :  { %866 = vtanh.f32 %v693_v36 }
 0x391   :  { %v865_v38 = vpop.eup %864 }
 0x392   :  { %698 = vst [vmem:[%s1098_s10] sm:$0xff] %v865_v38 }
 0x395   :  { %v867_v39 = vpop.eup %866 }
 0x396   :  { %699 = vst [vmem:[%s1098_s10 + $0x8] sm:$0xff] %v867_v39 }
 0x397   :  { %704 = vsyncpa [#allocation3], 1 }
 0x398   :  { %705 = vsyncpa [#allocation5], 1 }

// kernel: _forward_impl.3
= control target key start
LH: loop header
LB: loop body
LE: loop exit
PB: predicated region body
PF: predicated region fallthrough
CT: control target
= control target key end

     0   :  { %v861_v0 = vmov 0.0   ;;  %vm862_vm0 = vmmov 0   ;;  %v863_v48 = vmov 1.0   ;;  %v864_v49 = vmov -1e+30   ;;  %s1021_s0 = inlined_call_operand.vmem [shape: f32[128,128], index: 0, kind: input, shape index: {}]   ;;  %s1022_s1 = inlined_call_operand.vmem [shape: f32[128,128], index: 1, kind: input, shape index: {}]   ;;  %s1023_s2 = inlined_call_operand.vmem [shape: f32[2,128], index: 2, kind: input, shape index: {}]   ;;  %s1024_s3 = inlined_call_operand.vmem [shape: f32[1,1,128], index: 3, kind: output, shape index: {}]  }
   0x1   :  { %760 = vmatprep.subr.mxu0 %v861_v0  ;;  %20 = vst [vmem:[#allocation3] sm:$0x3] %v861_v0  ;;  %v36_v1 = vld [vmem:[%s1021_s0 + $0x78] sm:$0xff]  ;;  %v35_v2 = vld [vmem:[%s1021_s0 + $0x70] sm:$0xff]  ;;  %v34_v3 = vld [vmem:[%s1021_s0 + $0x68] sm:$0xff]  ;;  %792 = vmatprep.mubr.msk.f32.mxu0 %vm862_vm0, %v861_v0 }
   0x2   :  { %v68_v4 = vmul.f32 %v36_v1, %v36_v1  ;;  %v202_v5 = vpack.c.bf16 %v36_v1, %v35_v2  ;;  %v33_v6 = vld [vmem:[%s1021_s0 + $0x60] sm:$0xff]  ;;  %v67_v8 = vmul.f32 %v35_v2, %v35_v2  ;;  %v38_v10 = vld [vmem:[%s1022_s1 + $0x8] sm:$0xff]  ;;  %v32_v11 = vld [vmem:[%s1021_s0 + $0x58] sm:$0xff]  ;;  %v66_v13 = vmul.f32 %v34_v3, %v34_v3  ;;  %19 = vst [vmem:[#allocation2] sm:$0x1] %v864_v49 }
   0x3   :  { %v201_v7 = vpack.c.bf16 %v34_v3, %v33_v6  ;;  %v37_v9 = vld [vmem:[%s1022_s1] sm:$0xff]  ;;  %v31_v12 = vld [vmem:[%s1021_s0 + $0x50] sm:$0xff]  ;;  %v65_v17 = vmul.f32 %v33_v6, %v33_v6  ;;  %v30_v18 = vld [vmem:[%s1021_s0 + $0x48] sm:$0xff]  ;;  %v64_v20 = vmul.f32 %v32_v11, %v32_v11  ;;  %v300_v2 = vlaneseq }
   0x4   :  { %761 = vmatpush3.xpose.msra.mxu0 %v68_v4  ;;  %795 = vmatprep.subr.bf16.mxu1 %v202_v5  ;;  %v187_v14 = vpack.c.bf16 %v38_v10, %v37_v9  ;;  %v139_v15 = vmul.f32 %v37_v9, %v37_v9  ;;  %v200_v16 = vpack.c.bf16 %v32_v11, %v31_v12  ;;  %v29_v19 = vld [vmem:[%s1021_s0 + $0x40] sm:$0xff]  ;;  %v28_v23 = vld [vmem:[%s1021_s0 + $0x38] sm:$0xff]  ;;  %v27_v24 = vld [vmem:[%s1021_s0 + $0x30] sm:$0xff] }
   0x5   :  { %796 = vmatpush3.bf16.xpose.msra.mxu1 %v202_v5  ;;  %762 = vmatprep.subr.mxu0 %v861_v0  ;;  %v199_v21 = vpack.c.bf16 %v30_v18, %v29_v19  ;;  %v63_v22 = vmul.f32 %v31_v12, %v31_v12  ;;  %v62_v25 = vmul.f32 %v30_v18, %v30_v18  ;;  %v26_v28 = vld [vmem:[%s1021_s0 + $0x28] sm:$0xff]  ;;  %v25_v29 = vld [vmem:[%s1021_s0 + $0x20] sm:$0xff]  ;;  %v24_v33 = vld [vmem:[%s1021_s0 + $0x18] sm:$0xff]  ;;  %v301_v5 = vshrl.u32 %v300_v2, 7 }
   0x6   :  { %797 = vmatprep.subr.bf16.mxu1 %v201_v7  ;;  %811 = vmatprep.mubr.bf16.mxu1 %v187_v14  ;;  %v198_v26 = vpack.c.bf16 %v28_v23, %v27_v24  ;;  %v61_v27 = vmul.f32 %v29_v19, %v29_v19  ;;  %v60_v30 = vmul.f32 %v28_v23, %v28_v23  ;;  %v23_v34 = vld [vmem:[%s1021_s0 + $0x10] sm:$0xff]  ;;  %v22_v38 = vld [vmem:[%s1021_s0 + $0x8] sm:$0xff]  ;;  %v21_v39 = vld [vmem:[%s1021_s0] sm:$0xff] }
   0x7   :  { %155 = vadd.xlane.f32.xlu0 %v139_v15  ;;  %v197_v31 = vpack.c.bf16 %v26_v28, %v25_v29  ;;  %v59_v32 = vmul.f32 %v27_v24, %v27_v24  ;;  %v58_v35 = vmul.f32 %v26_v28, %v26_v28  ;;  %v196_v36 = vpack.c.bf16 %v24_v33, %v23_v34  ;;  %v39_v45 = vld [vmem:[%s1022_s1 + $0x10] sm:$0xff]  ;;  %v40_v46 = vld [vmem:[%s1022_s1 + $0x18] sm:$0xff]  ;;  %v41_v50 = vld [vmem:[%s1022_s1 + $0x20] sm:$0xff] }
   0x8   :  { %763 = vmatpush3.xpose.msra.mxu0 %v67_v8  ;;  %v57_v37 = vmul.f32 %v25_v29, %v25_v29  ;;  %v56_v40 = vmul.f32 %v24_v33, %v24_v33  ;;  %v195_v41 = vpack.c.bf16 %v22_v38, %v21_v39  ;;  %v55_v42 = vmul.f32 %v23_v34, %v23_v34  ;;  %v42_v51 = vld [vmem:[%s1022_s1 + $0x28] sm:$0xff]  ;;  %v43_v52 = vld [vmem:[%s1022_s1 + $0x30] sm:$0xff]  ;;  %v44_v54 = vld [vmem:[%s1022_s1 + $0x38] sm:$0xff] }
   0x9   :  { %764 = vmatprep.subr.mxu0 %v861_v0  ;;  %v54_v43 = vmul.f32 %v22_v38, %v22_v38  ;;  %v53_v44 = vmul.f32 %v21_v39, %v21_v39  ;;  %v188_v47 = vpack.c.bf16 %v40_v46, %v39_v45  ;;  %v189_v53 = vpack.c.bf16 %v42_v51, %v41_v50  ;;  %v45_v55 = vld [vmem:[%s1022_s1 + $0x40] sm:$0xff]  ;;  %v46_v56 = vld [vmem:[%s1022_s1 + $0x48] sm:$0xff]  ;;  %v47_v59 = vld [vmem:[%s1022_s1 + $0x50] sm:$0xff] }
   0xa   :  { %v190_v57 = vpack.c.bf16 %v44_v54, %v43_v52  ;;  %v191_v58 = vpack.c.bf16 %v46_v56, %v45_v55  ;;  %v48_v60 = vld [vmem:[%s1022_s1 + $0x58] sm:$0xff]  ;;  %v49_v61 = vld [vmem:[%s1022_s1 + $0x60] sm:$0xff]  ;;  %v50_v62 = vld [vmem:[%s1022_s1 + $0x68] sm:$0xff] }
   0xb   :  { %v192_v63 = vpack.c.bf16 %v48_v60, %v47_v59  ;;  %v193_v1 = vpack.c.bf16 %v50_v62, %v49_v61  ;;  %v51_v3 = vld [vmem:[%s1022_s1 + $0x70] sm:$0xff]  ;;  %v52_v4 = vld [vmem:[%s1022_s1 + $0x78] sm:$0xff]  ;;  %v693_v2 = vld [vmem:[#allocation3] sm:$0x3] }
   0xc   :  { %765 = vmatpush3.xpose.msra.mxu0 %v66_v13  ;;  %v194_v6 = vpack.c.bf16 %v52_v4, %v51_v3 }
   0xd   :  { %798 = vmatpush3.bf16.xpose.msra.mxu1 %v201_v7  ;;  %766 = vmatprep.subr.mxu0 %v861_v0  ;;  %v1003_v7 = vsub.s32 0, %v301_v5 }
   0xe   :  { %799 = vmatprep.subr.bf16.mxu1 %v200_v16 }
  0x10   :  { %767 = vmatpush3.xpose.msra.mxu0 %v65_v17 }
  0x11   :  { %768 = vmatprep.subr.mxu0 %v861_v0 }
  0x14   :  { %769 = vmatpush3.xpose.msra.mxu0 %v64_v20 }
  0x15   :  { %800 = vmatpush3.bf16.xpose.msra.mxu1 %v200_v16  ;;  %770 = vmatprep.subr.mxu0 %v861_v0 }
  0x16   :  { %801 = vmatprep.subr.bf16.mxu1 %v199_v21 }
  0x18   :  { %771 = vmatpush3.xpose.msra.mxu0 %v63_v22 }
  0x19   :  { %772 = vmatprep.subr.mxu0 %v861_v0 }
  0x1c   :  { %773 = vmatpush3.xpose.msra.mxu0 %v62_v25 }
  0x1d   :  { %802 = vmatpush3.bf16.xpose.msra.mxu1 %v199_v21  ;;  %774 = vmatprep.subr.mxu0 %v861_v0 }
  0x1e   :  { %803 = vmatprep.subr.bf16.mxu1 %v198_v26 }
  0x20   :  { %775 = vmatpush3.xpose.msra.mxu0 %v61_v27 }
  0x21   :  { %776 = vmatprep.subr.mxu0 %v861_v0 }
  0x24   :  { %777 = vmatpush3.xpose.msra.mxu0 %v60_v30 }
  0x25   :  { %804 = vmatpush3.bf16.xpose.msra.mxu1 %v198_v26  ;;  %778 = vmatprep.subr.mxu0 %v861_v0 }
  0x26   :  { %805 = vmatprep.subr.bf16.mxu1 %v197_v31 }
  0x28   :  { %779 = vmatpush3.xpose.msra.mxu0 %v59_v32 }
  0x29   :  { %780 = vmatprep.subr.mxu0 %v861_v0 }
  0x2c   :  { %781 = vmatpush3.xpose.msra.mxu0 %v58_v35 }
  0x2d   :  { %806 = vmatpush3.bf16.xpose.msra.mxu1 %v197_v31  ;;  %782 = vmatprep.subr.mxu0 %v861_v0 }
  0x2e   :  { %807 = vmatprep.subr.bf16.mxu1 %v196_v36 }
  0x30   :  { %783 = vmatpush3.xpose.msra.mxu0 %v57_v37 }
  0x31   :  { %784 = vmatprep.subr.mxu0 %v861_v0 }
  0x34   :  { %785 = vmatpush3.xpose.msra.mxu0 %v56_v40 }
  0x35   :  { %808 = vmatpush3.bf16.xpose.msra.mxu1 %v196_v36  ;;  %786 = vmatprep.subr.mxu0 %v861_v0  ;;  %v584_v36 = vld [vmem:[#allocation2] sm:$0x1] }
  0x36   :  { %809 = vmatprep.subr.bf16.mxu1 %v195_v41 }
  0x38   :  { %787 = vmatpush3.xpose.msra.mxu0 %v55_v42 }
  0x39   :  { %788 = vmatprep.subr.mxu0 %v861_v0 }
  0x3c   :  { %789 = vmatpush3.xpose.msra.mxu0 %v54_v43 }
  0x3d   :  { %810 = vmatpush3.bf16.xpose.msra.mxu1 %v195_v41  ;;  %790 = vmatprep.subr.mxu0 %v861_v0 }
  0x40   :  { %791 = vmatpush3.xpose.msra.mxu0 %v53_v44 }
  0x41   :  { %827 = vmatprep.subr.bf16.mxu0 %v861_v0 }
  0x43   :  { %793 = vmatmul.mubr.f32.vlgmr.msra.gmra.mxu0 %v863_v48  ;;  %v643_v48 = vld [vmem:[%s1023_s2] sm:$0x3] }
  0x44   :  { %812 = vmatmul.mubr.bf16.vlgmr.msra.gmra.mxu1 %v188_v47  ;;  %843 = vmatprep.mubr.msk.bf16.mxu0 %vm862_vm0, %v861_v0  ;;  %v644_v50 = vpack.c.bf16 %v643_v48, %v643_v48 }
  0x45   :  { %815 = vmatprep.mubr.bf16.mxu1 %v189_v53 }
  0x4c   :  { %816 = vmatmul.mubr.bf16.gmra.mxu1 %v190_v57 }
  0x4d   :  { %819 = vmatprep.mubr.bf16.mxu1 %v191_v58 }
  0x54   :  { %820 = vmatmul.mubr.bf16.gmra.mxu1 %v192_v63 }
  0x55   :  { %823 = vmatprep.mubr.bf16.mxu1 %v193_v1 }
  0x5c   :  { %824 = vmatmul.mubr.bf16.gmra.mxu1 %v194_v6 }
  0x90   :  { %v156_v9 = vpop.xlane.xlu0 %155 }
 0x103   :  { %v135_v8 = vpop.f32.mrf.mxu0 }
 0x104   :  { %v303_v10 = vrot.slane %v135_v8, %v1003_v7  ;;  %v813_v11 = vpop.f32.mrf.mxu1 }
 0x105   :  { %v794_v12 = vpop.f32.mrf.mxu0 }
 0x106   :  { %v304_v13 = vadd.f32 %v303_v10, %v156_v9  ;;  %v237_v14 = vpop.f32.mrf.mxu1 }
 0x107   :  { %v320_v15 = vmul.f32 2.0, %v237_v14 }
 0x108   :  { %v814_v16 = vpop.f32.mrf.mxu1 }
 0x109   :  { %v336_v17 = vsub.f32 %v304_v13, %v320_v15 }
 0x10a   :  { %v240_v18 = vpop.f32.mrf.mxu1 }
 0x10b   :  { %v352_v19 = vmax.f32 %v336_v17, 0.0 }
 0x10c   :  { %v817_v51 = vpop.f32.mrf.mxu1 }
 0x10d   :  { %851 = vrsqrt.f32 %v352_v19  ;;  %vm370_vm1 = vcmp.eq.f32.partialorder %v352_v19, inf  ;;  %v373_v22 = vand.u32 2147483648, %v352_v19  ;;  %vm372_vm2 = vcmp.eq.f32.partialorder %v352_v19, 0.0 }
 0x10e   :  { %v253_v52 = vpop.f32.mrf.mxu1 }
 0x110   :  { %v818_v53 = vpop.f32.mrf.mxu1 }
 0x112   :  { %v256_v54 = vpop.f32.mrf.mxu1 }
 0x114   :  { %v821_v55 = vpop.f32.mrf.mxu1 }
 0x116   :  { %v269_v56 = vpop.f32.mrf.mxu1 }
 0x118   :  { %v822_v57 = vpop.f32.mrf.mxu1 }
 0x11a   :  { %v852_v20 = vpop.eup %851  ;;  %v272_v58 = vpop.f32.mrf.mxu1 }
 0x11b   :  { %v369_v21 = vmul.f32 %v852_v20, %v352_v19 }
 0x11c   :  { %v825_v59 = vpop.f32.mrf.mxu1 }
 0x11d   :  { %v371_v23 = vsel %vm370_vm1, %v352_v19, %v369_v21 }
 0x11e   :  { %v374_v24 = vsel %vm372_vm2, %v373_v22, %v371_v23  ;;  %v285_v60 = vpop.f32.mrf.mxu1 }
 0x11f   :  { %v480_v25 = vsub.f32 0.0, %v374_v24 }
 0x120   :  { %v826_v61 = vpop.f32.mrf.mxu1 }
 0x121   :  { %v563_v26 = vmax.f32 %v480_v25, -1e+30 }
 0x122   :  { %v288_v62 = vpop.f32.mrf.mxu1 }
 0x123   :  { %v567_v27 = vmax.f32 %v563_v26, -1e+30 }
 0x125   :  { %v571_v28 = vmax.f32 %v567_v27, -1e+30 }
 0x127   :  { %v575_v29 = vmax.f32 %v571_v28, -1e+30 }
 0x129   :  { %v577_v30 = vmax.f32 %v575_v29, -1e+30 }
 0x12b   :  { %v578_v31 = vrot.slane %v577_v30, 4 }
 0x12d   :  { %v579_v32 = vmax.f32 %v577_v30, %v578_v31 }
 0x12f   :  { %v580_v33 = vrot.slane %v579_v32, 2 }
 0x131   :  { %v581_v34 = vmax.f32 %v579_v32, %v580_v33 }
 0x133   :  { %v582_v35 = vrot.slane %v581_v34, 1 }
 0x135   :  { %v583_v37 = vmax.f32 %v581_v34, %v582_v35 }
 0x137   :  { %v585_v38 = vmax.f32 %v584_v36, %v583_v37 }
 0x139   :  { %v593_v39 = vrot.slane %v585_v38, %v1003_v7  ;;  %703 = vst [vmem:[#allocation2] sm:$0x1] %v585_v38  ;;  %v586_v40 = vsub.f32 %v584_v36, %v585_v38 }
 0x13b   :  { %v596_v41 = vsub.f32 -1e+30, %v593_v39  ;;  %v595_v45 = vsub.f32 %v480_v25, %v593_v39  ;;  %v587_v63 = vmul.f32 1.442695, %v586_v40 }
 0x13d   :  { %v613_v42 = vmul.f32 1.442695, %v596_v41  ;;  %v611_v46 = vmul.f32 1.442695, %v595_v45 }
 0x13f   :  { %853 = vpow2.f32 %v613_v42 }
 0x140   :  { %855 = vpow2.f32 %v611_v46 }
 0x141   :  { %857 = vpow2.f32 %v587_v63 }
 0x14c   :  { %v854_v43 = vpop.eup %853 }
 0x14d   :  { %v646_v44 = vpack.c.bf16 %v854_v43, %v854_v43  ;;  %v856_v47 = vpop.eup %855 }
 0x14e   :  { %v645_v49 = vpack.c.bf16 %v854_v43, %v856_v47  ;;  %v858_v1 = vpop.eup %857 }
 0x14f   :  { %828 = vmatpush3.bf16.msra.mxu0 %v646_v44 }
 0x150   :  { %829 = vmatprep.subr.bf16.mxu0 %v861_v0 }
 0x153   :  { %830 = vmatpush3.bf16.msra.mxu0 %v646_v44 }
 0x154   :  { %831 = vmatprep.subr.bf16.mxu0 %v861_v0 }
 0x157   :  { %832 = vmatpush3.bf16.msra.mxu0 %v646_v44 }
 0x158   :  { %833 = vmatprep.subr.bf16.mxu0 %v861_v0 }
 0x15b   :  { %834 = vmatpush3.bf16.msra.mxu0 %v646_v44 }
 0x15c   :  { %835 = vmatprep.subr.bf16.mxu0 %v861_v0 }
 0x15f   :  { %836 = vmatpush3.bf16.msra.mxu0 %v646_v44 }
 0x160   :  { %837 = vmatprep.subr.bf16.mxu0 %v861_v0 }
 0x163   :  { %838 = vmatpush3.bf16.msra.mxu0 %v646_v44 }
 0x164   :  { %839 = vmatprep.subr.bf16.mxu0 %v861_v0 }
 0x167   :  { %840 = vmatpush3.bf16.msra.mxu0 %v646_v44 }
 0x168   :  { %841 = vmatprep.subr.bf16.mxu0 %v861_v0  ;;  %v698_v0 = vrot.slane %v858_v1, %v1003_v7 }
 0x16a   :  { %v700_v3 = vmul.f32 %v698_v0, %v693_v2 }
 0x16b   :  { %842 = vmatpush3.bf16.msra.mxu0 %v645_v49 }
 0x16e   :  { %844 = vmatmul.mubr.bf16.vlgmr.msra.gmra.mxu0 %v644_v50 }
 0x22e   :  { %v687_v4 = vpop.f32.mrf.mxu0 }
 0x22f   :  { %v701_v5 = vadd.f32 %v700_v3, %v687_v4 }
 0x230   :  { %v845_v6 = vpop.f32.mrf.mxu0 }
 0x231   :  { %702 = vst [vmem:[#allocation3] sm:$0x3] %v701_v5 }
 0x232   :  { %v690_v8 = vpop.f32.mrf.mxu0 }
 0x234   :  { %v846_v9 = vpop.f32.mrf.mxu0 }
 0x238   :  { %v708_v10 = vld [vmem:[#allocation3 + $0x1] sm:$0x1]  ;;  %v707_v12 = vld [vmem:[#allocation3] sm:$0x1] }
 0x239   :  { %859 = vrcp.f32 %v708_v10 }
 0x246   :  { %v860_v11 = vpop.eup %859 }
 0x247   :  { %v710_v13 = vmul.f32 %v860_v11, %v707_v12 }
 0x249   :  { %v711_v14 = vmax.f32 %v710_v13, 0.0 }
 0x24b   :  { %v712_v15 = vmin.f32 %v711_v14, 1.0 }
 0x24d   :  { %713 = vst [vmem:[%s1024_s3] sm:$0x1] %v712_v15 }

</bundles_post_ra>
